<compile_context>
chip_gen: v6e
topology: v6e:2x2x1
jax: 0.10.0
libtpu: 0.0.40
codegen_flags: <defaults>
</compile_context>

<pallas_src>
import functools
import math

import jax
import jax.numpy as jnp
from jax.experimental import pallas as pl
from jax.experimental.pallas import tpu as pltpu


_VMEM_INPUT_BUDGET = 8 * 1024 * 1024    # double-buffered input streams (fits v5e 16 MiB scoped VMEM)
_VMEM_LIMIT_BYTES = 32 * 1024 * 1024    # safe scoped-VMEM request on v5e / v6e / v7x
_TILE_CANDIDATES = (2048, 1024, 512, 256, 128)
_TARGET_BLOCK_ELEMS = 256 * 1024        # ~1 MiB (f32) streamed per input per grid step


def _round_up(x: int, m: int) -> int:
    return ((x + m - 1) // m) * m


def _errors_mask(gt, pred, threshold, assume_positive):
    if assume_positive:
        # max(gt/pred, pred/gt) < thr  <=>  max(gt,pred) < thr*min(gt,pred)   (gt, pred > 0)
        # Divide-free: pure VPU (max/min/mul/cmp), no EUP divides in the hot loop.
        return jnp.maximum(gt, pred) < threshold * jnp.minimum(gt, pred)
    # Exact reference form (handles zeros/negatives the same way as the torch module).
    return jnp.maximum(gt / pred, pred / gt) < threshold


def _delta_unweighted_kernel(gt_ref, pred_ref, se_ref,
                             *, threshold, assume_positive, tile_d):
    k = pl.program_id(1)

    @pl.when(k == 0)
    def _():
        se_ref[...] = jnp.zeros_like(se_ref)

    gt = gt_ref[...].astype(jnp.float32)
    pred = pred_ref[...].astype(jnp.float32)

    ok = _errors_mask(gt, pred, threshold, assume_positive)
    e = jnp.where(ok, jnp.float32(1.0), jnp.float32(0.0))

    # Lane-wide accumulation directly into the resident output block: VPU adds only.
    a = se_ref[...]
    for j in range(tile_d // 128):
        a = a + e[:, j * 128:(j + 1) * 128]
    se_ref[...] = a


def _delta_weighted_kernel(gt_ref, pred_ref, w_ref, sew_ref, sw_ref,
                           *, threshold, assume_positive, tile_d):
    k = pl.program_id(1)

    @pl.when(k == 0)
    def _():
        sew_ref[...] = jnp.zeros_like(sew_ref)
        sw_ref[...] = jnp.zeros_like(sw_ref)

    gt = gt_ref[...].astype(jnp.float32)
    pred = pred_ref[...].astype(jnp.float32)
    w = w_ref[...].astype(jnp.float32)

    ok = _errors_mask(gt, pred, threshold, assume_positive)
    ew = jnp.where(ok, w, jnp.float32(0.0))     # select weight or 0: no convert+mul

    a_ew = sew_ref[...]
    a_w = sw_ref[...]
    for j in range(tile_d // 128):
        sl = slice(j * 128, (j + 1) * 128)
        a_ew = a_ew + ew[:, sl]
        a_w = a_w + w[:, sl]
    sew_ref[...] = a_ew
    sw_ref[...] = a_w


def delta(gt, pred, weights=None, threshold: float = 1.25, assume_positive: bool = True):
    """JAX/Pallas equivalent of moai Delta.forward.

    gt, pred, weights: (N, C, H, W) arrays (any float dtype; kept native through DMA).
    assume_positive=True uses the divide-free comparison (valid for strictly
    positive depth values); set False for the exact division form of the reference.
    Returns a scalar float32.
    """
    n = gt.shape[0]
    d = int(math.prod(gt.shape[1:]))

    gt_f = gt.reshape(n, d)
    pred_f = pred.reshape(n, d)
    unweighted = weights is None
    w_f = None if unweighted else weights.reshape(n, d)

    streams = 2 if unweighted else 3
    itemsizes = [jnp.dtype(gt_f.dtype).itemsize, jnp.dtype(pred_f.dtype).itemsize]
    if not unweighted:
        itemsizes.append(jnp.dtype(w_f.dtype).itemsize)
    max_bytes = max(itemsizes)
    min_bytes = min(itemsizes)

    # Fill vreg sublanes: (N, D) -> (rows, D_r) with rows a multiple of the
    # sublane packing for the narrowest streamed dtype.
    row_mult = {4: 8, 2: 16, 1: 32}.get(min_bytes, 8)

    def pick_tile(r):
        rows = n * r
        d_r_raw = max(1, -(-d // r))
        tile_cap = _round_up(d_r_raw, 128)
        tile = 128
        for cand in _TILE_CANDIDATES:
            if cand <= tile_cap and streams * 2 * rows * cand * max_bytes <= _VMEM_INPUT_BUDGET:
                tile = cand
                break
        return rows, tile, d_r_raw

    r = row_mult // math.gcd(n, row_mult)
    rows, tile_d, d_r_raw = pick_tile(r)

    # Grow the row replication while there is plenty of reduction work so each
    # grid step streams a large block (amortizes fixed per-step cost).  Stop if
    # the block no longer grows (VMEM-budget capped) or padding would become
    # significant / the v7x parallel split would be starved (steps < 8).
    while True:
        steps_raw = -(-d_r_raw // tile_d)
        if steps_raw < 8 or rows * tile_d >= _TARGET_BLOCK_ELEMS:
            break
        nrows, ntile, ndraw = pick_tile(r * 2)
        if nrows * ntile <= rows * tile_d:
            break
        r *= 2
        rows, tile_d, d_r_raw = nrows, ntile, ndraw

    # v7x: split D over two parallel grid halves so both TensorCores stream data.
    steps_raw = max(1, -(-d_r_raw // tile_d))
    num_parts = 2 if steps_raw >= 4 else 1
    steps_total = _round_up(steps_raw, num_parts)
    steps_per_part = steps_total // num_parts
    d_r = steps_total * tile_d
    d_pad = r * d_r

    if d_pad != d:
        pad = ((0, 0), (0, d_pad - d))
        # Zero padding: padded elements give error == 0 (both compare forms) and weight == 0.
        gt_f = jnp.pad(gt_f, pad)
        pred_f = jnp.pad(pred_f, pad)
        if not unweighted:
            w_f = jnp.pad(w_f, pad)

    gt_r = gt_f.reshape(rows, d_r)
    pred_r = pred_f.reshape(rows, d_r)
    if not unweighted:
        w_r = w_f.reshape(rows, d_r)

    in_spec = pl.BlockSpec((rows, tile_d), lambda p, k: (0, p * steps_per_part + k))
    out_spec = pl.BlockSpec((None, rows, 128), lambda p, k: (p, 0, 0))
    grid = (num_parts, steps_per_part)
    cparams = pltpu.CompilerParams(
        dimension_semantics=("parallel", "arbitrary"),
        vmem_limit_bytes=_VMEM_LIMIT_BYTES)

    if unweighted:
        kernel = functools.partial(
            _delta_unweighted_kernel, threshold=float(threshold),
            assume_positive=assume_positive, tile_d=tile_d)
        se = pl.pallas_call(
            kernel,
            out_shape=jax.ShapeDtypeStruct((num_parts, rows, 128), jnp.float32),
            grid_spec=pltpu.PrefetchScalarGridSpec(
                num_scalar_prefetch=0,
                grid=grid,
                in_specs=[in_spec, in_spec],
                out_specs=out_spec,
            ),
            compiler_params=cparams,
        )(gt_r, pred_r)
        # torch.mean(errors): padded elements contribute 0, denominator is the true count.
        return jnp.sum(se) / jnp.float32(n * d)

    kernel = functools.partial(
        _delta_weighted_kernel, threshold=float(threshold),
        assume_positive=assume_positive, tile_d=tile_d)
    sew, sw = pl.pallas_call(
        kernel,
        out_shape=(
            jax.ShapeDtypeStruct((num_parts, rows, 128), jnp.float32),
            jax.ShapeDtypeStruct((num_parts, rows, 128), jnp.float32),
        ),
        grid_spec=pltpu.PrefetchScalarGridSpec(
            num_scalar_prefetch=0,
            grid=grid,
            in_specs=[in_spec, in_spec, in_spec],
            out_specs=[out_spec, out_spec],
        ),
        compiler_params=cparams,
    )(gt_r, pred_r, w_r)

    # Regroup the per-row lane-wide partial sums back into per-sample sums
    # (rows are sample-major: sample i owns rows [i*r, (i+1)*r)).
    sew_n = sew.sum(axis=(0, 2)).reshape(n, r).sum(axis=1)
    sw_n = sw.sum(axis=(0, 2)).reshape(n, r).sum(axis=1)
    return jnp.mean(sew_n / sw_n)


def _delta_ref(gt, pred, weights=None, threshold=1.25):
    gt = gt.astype(jnp.float32)
    pred = pred.astype(jnp.float32)
    errors = (jnp.maximum(gt / pred, pred / gt) < threshold).astype(jnp.float32)
    if weights is None:
        return jnp.mean(errors)
    dims = tuple(range(1, gt.ndim))
    w = weights.astype(jnp.float32)
    return jnp.mean(jnp.sum(errors * w, axis=dims) / jnp.sum(w, axis=dims))


if __name__ == "__main__":
    key = jax.random.PRNGKey(0)
    k1, k2, k3 = jax.random.split(key, 3)

    N, C, H, W = 2, 4, 16, 16
    gt = jax.random.uniform(k1, (N, C, H, W), jnp.float32, minval=0.5, maxval=5.0)
    pred = jax.random.uniform(k2, (N, C, H, W), jnp.float32, minval=0.5, maxval=5.0)
    weights = jax.random.uniform(k3, (N, C, H, W), jnp.float32, minval=0.1, maxval=1.0)

    # Unweighted path (divide-free fast path; depths here are strictly positive).
    out_u = jax.block_until_ready(delta(gt, pred))
    ref_u = _delta_ref(gt, pred)
    assert jnp.allclose(out_u, ref_u, rtol=1e-5, atol=1e-6), (out_u, ref_u)

    # Weighted path.
    out_w = jax.block_until_ready(delta(gt, pred, weights))
    ref_w = _delta_ref(gt, pred, weights)
    assert jnp.allclose(out_w, ref_w, rtol=1e-5, atol=1e-6), (out_w, ref_w)

    # Exact-division path (no positivity assumption) matches the reference form.
    out_w2 = jax.block_until_ready(delta(gt, pred, weights, assume_positive=False))
    assert jnp.allclose(out_w2, ref_w, rtol=1e-5, atol=1e-6), (out_w2, ref_w)

    # Ragged shape (D not a multiple of 128) exercises the zero-padding path.
    g2 = jax.random.uniform(k1, (3, 1, 17, 13), jnp.float32, minval=0.5, maxval=5.0)
    p2 = jax.random.uniform(k2, (3, 1, 17, 13), jnp.float32, minval=0.5, maxval=5.0)
    out_r = jax.block_until_ready(delta(g2, p2))
    ref_r = _delta_ref(g2, p2)
    assert jnp.allclose(out_r, ref_r, rtol=1e-5, atol=1e-6), (out_r, ref_r)

    # Native-bf16 inputs stay bf16 through the DMA (half the HBM traffic).
    gtb = gt.astype(jnp.bfloat16)
    predb = pred.astype(jnp.bfloat16)
    out_b = jax.block_until_ready(delta(gtb, predb, assume_positive=False))
    ref_b = _delta_ref(gtb, predb)
    assert jnp.allclose(out_b, ref_b, rtol=1e-5, atol=1e-6), (out_b, ref_b)

    print("KERNEL_OK")
</pallas_src>

<mosaic_0001>
module attributes {stable_mosaic.version = 11 : i64} {
  func.func @_delta_unweighted_kernel(%arg0: i32, %arg1: i32, %arg2: memref<8x256xf32, #tpu.memory_space<vmem>>, %arg3: memref<8x256xf32, #tpu.memory_space<vmem>>, %arg4: memref<1x8x128xf32, #tpu.memory_space<vmem>>) attributes {dimension_semantics = [#tpu.dimension_semantics<parallel>, #tpu.dimension_semantics<arbitrary>], iteration_bounds = array<i64: 1, 1>, scalar_prefetch = 0 : i64, scratch_operands = 0 : i64, tpu.core_type = #tpu.core_type<tc>, window_params = [{transform_indices = @transform_0, window_bounds = array<i64: 8, 256>}, {transform_indices = @transform_1, window_bounds = array<i64: 8, 256>}, {transform_indices = @transform_2, window_bounds = array<i64: 1, 8, 128>}]} {
    %c0_i32 = arith.constant 0 : i32
    %0 = arith.cmpi eq, %arg1, %c0_i32 : i32
    %1 = arith.extui %0 : i1 to i32
    %c0_i32_0 = arith.constant 0 : i32
    %2 = arith.cmpi ne, %1, %c0_i32_0 : i32
    scf.if %2 {
      %cst_12 = arith.constant 0.000000e+00 : f32
      %22 = vector.broadcast %cst_12 : f32 to vector<8x128xf32>
      %c0_13 = arith.constant 0 : index
      %c0_14 = arith.constant 0 : index
      %c0_15 = arith.constant 0 : index
      %23 = vector.load %arg4[%c0_13, %c0_14, %c0_15] : memref<1x8x128xf32, #tpu.memory_space<vmem>>, vector<1x8x128xf32>
      %24 = vector.shape_cast %23 : vector<1x8x128xf32> to vector<8x128xf32>
      %25 = vector.shape_cast %22 : vector<8x128xf32> to vector<1x8x128xf32>
      tpu.vector_store %arg4[%c0_13, %c0_14, %c0_15], %25 {strides = array<i32>} : memref<1x8x128xf32, #tpu.memory_space<vmem>>, vector<1x8x128xf32>,
    } else {
    }
    %c0 = arith.constant 0 : index
    %c0_1 = arith.constant 0 : index
    %3 = vector.load %arg2[%c0, %c0_1] : memref<8x256xf32, #tpu.memory_space<vmem>>, vector<8x256xf32>
    %c0_2 = arith.constant 0 : index
    %c0_3 = arith.constant 0 : index
    %4 = vector.load %arg3[%c0_2, %c0_3] : memref<8x256xf32, #tpu.memory_space<vmem>>, vector<8x256xf32>
    %5 = arith.maximumf %3, %4 : vector<8x256xf32>
    %6 = arith.minimumf %3, %4 : vector<8x256xf32>
    %cst = arith.constant 1.250000e+00 : f32
    %7 = vector.broadcast %cst : f32 to vector<8x256xf32>
    %8 = arith.mulf %7, %6 : vector<8x256xf32>
    %9 = arith.cmpf olt, %5, %8 : vector<8x256xf32>
    %cst_4 = arith.constant 1.000000e+00 : f32
    %cst_5 = arith.constant 0.000000e+00 : f32
    %10 = vector.broadcast %cst_4 : f32 to vector<8x256xf32>
    %11 = vector.broadcast %cst_5 : f32 to vector<8x256xf32>
    %12 = arith.select %9, %10, %11 : vector<8x256xi1>, vector<8x256xf32>
    %c0_6 = arith.constant 0 : index
    %c0_7 = arith.constant 0 : index
    %c0_8 = arith.constant 0 : index
    %13 = vector.load %arg4[%c0_6, %c0_7, %c0_8] : memref<1x8x128xf32, #tpu.memory_space<vmem>>, vector<1x8x128xf32>
    %14 = vector.shape_cast %13 : vector<1x8x128xf32> to vector<8x128xf32>
    %15 = vector.extract_strided_slice %12 {offsets = [0, 0], sizes = [8, 128], strides = [1, 1]} : vector<8x256xf32> to vector<8x128xf32>
    %16 = arith.addf %14, %15 : vector<8x128xf32>
    %17 = vector.extract_strided_slice %12 {offsets = [0, 128], sizes = [8, 128], strides = [1, 1]} : vector<8x256xf32> to vector<8x128xf32>
    %18 = arith.addf %16, %17 : vector<8x128xf32>
    %c0_9 = arith.constant 0 : index
    %c0_10 = arith.constant 0 : index
    %c0_11 = arith.constant 0 : index
    %19 = vector.load %arg4[%c0_9, %c0_10, %c0_11] : memref<1x8x128xf32, #tpu.memory_space<vmem>>, vector<1x8x128xf32>
    %20 = vector.shape_cast %19 : vector<1x8x128xf32> to vector<8x128xf32>
    %21 = vector.shape_cast %18 : vector<8x128xf32> to vector<1x8x128xf32>
    tpu.vector_store %arg4[%c0_9, %c0_10, %c0_11], %21 {strides = array<i32>} : memref<1x8x128xf32, #tpu.memory_space<vmem>>, vector<1x8x128xf32>,
    return
  }
  func.func @transform_0(%arg0: i32, %arg1: i32) -> (i32, i32) {
    %c1_i32 = arith.constant 1 : i32
    %0 = arith.muli %arg0, %c1_i32 : i32
    %1 = arith.addi %0, %arg1 : i32
    %c0_i32 = arith.constant 0 : i32
    %c0_i32_0 = arith.constant 0 : i32
    return %c0_i32, %1 : i32, i32
  }
  func.func @transform_1(%arg0: i32, %arg1: i32) -> (i32, i32) {
    %c1_i32 = arith.constant 1 : i32
    %0 = arith.muli %arg0, %c1_i32 : i32
    %1 = arith.addi %0, %arg1 : i32
    %c0_i32 = arith.constant 0 : i32
    %c0_i32_0 = arith.constant 0 : i32
    return %c0_i32, %1 : i32, i32
  }
  func.func @transform_2(%arg0: i32, %arg1: i32) -> (i32, i32, i32) {
    %c0_i32 = arith.constant 0 : i32
    %c0_i32_0 = arith.constant 0 : i32
    %c0_i32_1 = arith.constant 0 : i32
    return %arg0, %c0_i32, %c0_i32_0 : i32, i32, i32
  }
}

</mosaic_0001>

<bundles_post_ra>
// kernel: tpu_custom_call.1
= control target key start
LH: loop header
LB: loop body
LE: loop exit
PB: predicated region body
PF: predicated region fallthrough
CT: control target
= control target key end

     0   :  { %7 = vsyncpa [#allocation3], 0  ;;  %s185_s0 = inlined_call_operand.hbm [shape: f32[8,256], index: 0, kind: input, shape index: {}]   ;;  %s186_s1 = inlined_call_operand.hbm [shape: f32[8,256], index: 1, kind: input, shape index: {}]   ;;  %s187_s2 = inlined_call_operand.hbm [shape: f32[1,8,128], index: 2, kind: output, shape index: {}]  }
   0x1   :  { %8 = vsyncpa [#allocation6], 0 }
   0x2   :  { %9 = vsyncpa [#allocation4], 0  ;;  %s157_s9 = smov [#allocation2]   ;;  %s158_s11 = smov [#allocation5]  }
   0x3   :  { %s20_s10 = sshll.u32 %s157_s9, 4  ;;  %s34_s12 = sshll.u32 %s158_s11, 4  ;;  %s21_s10 = int_to_ptr.vmem [resolvable:$true] %s20_s10  ;;  %s35_s12 = int_to_ptr.vmem [resolvable:$true] %s34_s12 }
   0x4   :  { %s99_s13 = scalar_lea.vmem %s21_s10, 256  ;;  %p104_p1 = scmp.lt.s32.totalorder %s21_s10, %s21_s10 }
   0x5   :  { %p100_p0 = scmp.ne.s32.totalorder %s21_s10, %s99_s13  ;;  %p105_p2 = scmp.lt.s32.totalorder %s99_s13, %s99_s13 }
   0x7   :  { %p106_p3 = por %p105_p2, %p104_p1 }
   0x9   :  { %p107_p4 = pnand %p106_p3, %p100_p0 }
   0xb   :  { %110 = shalt.err (!%p107_p4)
}
   0xc   :  { %23 = dma.hbm_to_vmem [thread:$0]  %s185_s0, 256, %s21_s10, [#allocation3]  }
   0xd   :  { %s119_s16 = scalar_lea.vmem %s35_s12, 256  ;;  %p124_p6 = scmp.lt.s32.totalorder %s35_s12, %s35_s12 }
   0xe   :  { %p120_p5 = scmp.ne.s32.totalorder %s35_s12, %s119_s16  ;;  %p125_p7 = scmp.lt.s32.totalorder %s119_s16, %s119_s16 }
  0x10   :  { %p126_p8 = por %p125_p7, %p124_p6 }
  0x12   :  { %p127_p9 = pnand %p126_p8, %p120_p5 }
  0x14   :  { %130 = shalt.err (!%p127_p9)
}
  0x15   :  { %37 = dma.hbm_to_vmem [thread:$0]  %s186_s1, 256, %s35_s12, [#allocation6]  }
  0x16   :  { %151 = dma.done.wait [#allocation3], 256  }
  0x17   :  { %152 = vsyncadd [#allocation3], 4294967040 }
  0x18   :  { %153 = dma.done.wait [#allocation6], 256  }
  0x19   :  { %154 = vsyncadd [#allocation6], 4294967040  ;;  %v53_v0 = vld [vmem:[#allocation2] sm:$0xff]  ;;  %v54_v1 = vld [vmem:[#allocation2 + $0x8] sm:$0xff]  ;;  %v159_v10 = vmov 0.0   ;;  %s160_s0 = smov [#allocation7]  }
  0x1a   :  { %v55_v2 = vld [vmem:[#allocation5] sm:$0xff]  ;;  %v56_v3 = vld [vmem:[#allocation5 + $0x8] sm:$0xff]  ;;  %s77_s1 = sshll.u32 %s160_s0, 4  ;;  %s78_s1 = int_to_ptr.vmem [resolvable:$true] %s77_s1 }
  0x1b   :  { %v57_v4 = vmax.f32 %v53_v0, %v55_v2  ;;  %v59_v5 = vmin.f32 %v53_v0, %v55_v2  ;;  %v58_v6 = vmax.f32 %v54_v1, %v56_v3  ;;  %v60_v7 = vmin.f32 %v54_v1, %v56_v3  ;;  %s131_s19 = scalar_lea.vmem %s78_s1, 128  ;;  %p136_p11 = scmp.lt.s32.totalorder %s78_s1, %s78_s1 }
  0x1c   :  { %p132_p10 = scmp.ne.s32.totalorder %s78_s1, %s131_s19  ;;  %p137_p12 = scmp.lt.s32.totalorder %s131_s19, %s131_s19 }
  0x1d   :  { %v61_v8 = vmul.f32 1.25, %v59_v5  ;;  %v62_v9 = vmul.f32 1.25, %v60_v7 }
  0x1e   :  { %p138_p13 = por %p137_p12, %p136_p11 }
  0x1f   :  { %vm63_vm0 = vcmp.lt.f32.partialorder %v57_v4, %v61_v8  ;;  %vm64_vm1 = vcmp.lt.f32.partialorder %v58_v6, %v62_v9 }
  0x20   :  { %v65_v11 = vsel %vm63_vm0, 1.0, %v159_v10  ;;  %v66_v12 = vsel %vm64_vm1, 1.0, %v159_v10  ;;  %p139_p0 = pnand %p138_p13, %p132_p10 }
  0x21   :  { %v69_v13 = vadd.f32 %v66_v12, %v65_v11 }
  0x23   :  { %70 = vst [vmem:[#allocation7] sm:$0xff] %v69_v13 }
  0x24   :  { %142 = shalt.err (!%p139_p0)
}
  0x25   :  { %80 = dma.vmem_to_hbm [thread:$0]  %s78_s1, 128, %s187_s2, [#allocation4]  }
  0x26   :  { %155 = dma.done.wait [#allocation4], 128  }
  0x27   :  { %156 = vsyncadd [#allocation4], 4294967168 }
  0x28   :  { %84 = vsyncpa [#allocation3], 1 }
  0x29   :  { %85 = vsyncpa [#allocation6], 1 }
  0x2a   :  { %86 = vsyncpa [#allocation4], 1 }

</bundles_post_ra>
